<compile_context>
chip_gen: v7x
topology: tpu7x:2x2x1
jax: 0.10.0
libtpu: 0.0.40
codegen_flags: <defaults>
</compile_context>

<pallas_src>
import functools

import jax
import jax.numpy as jnp
from jax.experimental import pallas as pl
from jax.experimental.pallas import tpu as pltpu


def _equi_norm_and_gate_body(inv_ref, equi_ref, w_eq_a_ref, w_eq_n_ref,
                             inv_out_ref, equi_out_ref, inv_proj_fn,
                             *, eps, mxu_dtype):
    """Shared body: tall equi matmuls + norms + gating, given an inv-proj fn."""
    _, tm, f = equi_ref.shape                      # block is (3, TM, F)

    # Free collapse of the xyz axis into sublanes (TM is tile aligned):
    # [3, TM, F] -> [3*TM, F].  One tall matmul per weight half.
    equi_m = equi_ref[...].reshape(3 * tm, f).astype(mxu_dtype)

    # (1) Norm half of the equivariant projection: ONE tall MXU matmul,
    #     then an f32 reduction over the three coordinate slabs.
    norm_tall = jnp.dot(equi_m, w_eq_n_ref[...],
                        preferred_element_type=jnp.float32)   # [3*TM, F] f32
    sumsq = None
    for c in range(3):                             # static, sublane-aligned slices
        nc = norm_tall[c * tm:(c + 1) * tm]
        sq = nc * nc
        sumsq = sq if sumsq is None else sumsq + sq
    norms = jnp.sqrt(sumsq) + eps                  # [TM, F] f32, eps OUTSIDE sqrt

    # (2) Invariant projection + gate.  Norms stay f32; cast only at the
    #     dot inputs (accumulation is f32 via preferred_element_type).
    x_m = inv_ref[...].astype(mxu_dtype)
    n_m = norms.astype(mxu_dtype)
    inv_out, gate = inv_proj_fn(x_m, n_m)          # both f32
    inv_out_ref[...] = inv_out.astype(inv_out_ref.dtype)

    # (3) Equi half: ONE tall MXU matmul, then streamed per-coordinate gated
    #     stores (nothing held live across the inv projection, stores spread
    #     out for v5e's single vst slot).
    equi_tall = jnp.dot(equi_m, w_eq_a_ref[...],
                        preferred_element_type=jnp.float32)   # [3*TM, F] f32
    for c in range(3):
        part = equi_tall[c * tm:(c + 1) * tm]
        equi_out_ref[c] = (part * gate).astype(equi_out_ref.dtype)


def _gated_equi_kernel_fused(inv_ref, equi_ref, w_eq_a_ref, w_eq_n_ref,
                             w_i_ref, w_n_ref, b_ref,
                             inv_out_ref, equi_out_ref,
                             *, eps, d_model, mxu_dtype):
    """Inv projection as 2 fused dots; lane-aligned split (D % 128 == 0)."""
    def inv_proj(x_m, n_m):
        proj = (jnp.dot(x_m, w_i_ref[...], preferred_element_type=jnp.float32)
                + jnp.dot(n_m, w_n_ref[...], preferred_element_type=jnp.float32)
                + b_ref[...])                      # [TM, D+F] f32, lane dense
        return proj[:, :d_model], proj[:, d_model:]
    _equi_norm_and_gate_body(inv_ref, equi_ref, w_eq_a_ref, w_eq_n_ref,
                             inv_out_ref, equi_out_ref, inv_proj,
                             eps=eps, mxu_dtype=mxu_dtype)


def _gated_equi_kernel_split(inv_ref, equi_ref, w_eq_a_ref, w_eq_n_ref,
                             w_ii_ref, w_ig_ref, w_ni_ref, w_ng_ref,
                             b_i_ref, b_g_ref,
                             inv_out_ref, equi_out_ref,
                             *, eps, mxu_dtype):
    """Inv projection with pre-split weights (used when D % 128 != 0)."""
    def inv_proj(x_m, n_m):
        inv_out = (jnp.dot(x_m, w_ii_ref[...], preferred_element_type=jnp.float32)
                   + jnp.dot(n_m, w_ni_ref[...], preferred_element_type=jnp.float32)
                   + b_i_ref[...])
        gate = (jnp.dot(x_m, w_ig_ref[...], preferred_element_type=jnp.float32)
                + jnp.dot(n_m, w_ng_ref[...], preferred_element_type=jnp.float32)
                + b_g_ref[...])
        return inv_out, gate
    _equi_norm_and_gate_body(inv_ref, equi_ref, w_eq_a_ref, w_eq_n_ref,
                             inv_out_ref, equi_out_ref, inv_proj,
                             eps=eps, mxu_dtype=mxu_dtype)


def _round_up(x, m):
    return ((x + m - 1) // m) * m


def gated_equi_update(inv_feats, equi_feats, w_equi, w_inv, b_inv,
                      *, eps=1e-5, tm=1024, mxu_dtype=None):
    """Forward pass of GatedEquiUpdate.

    inv_feats : [B, N, D]      invariant features
    equi_feats: [B, N, F, 3]   equivariant features (PyTorch layout)
    w_equi    : [F, 2F]        equi_proj weight, pre-transposed (y = x @ W)
    w_inv     : [D+F, D+F]     inv_proj weight, pre-transposed
    b_inv     : [1, D+F]       inv_proj bias
    mxu_dtype : dtype fed to the MXU (None -> input dtype).  Accumulation and
                all elementwise math are always f32; outputs keep input dtype.
    """
    B, N, D = inv_feats.shape
    F = equi_feats.shape[2]
    M = B * N

    if mxu_dtype is None:
        mxu_dtype = inv_feats.dtype
    mxu_dtype = jnp.dtype(mxu_dtype)
    in_bytes = mxu_dtype.itemsize
    out_bytes = max(jnp.dtype(inv_feats.dtype).itemsize,
                    jnp.dtype(equi_feats.dtype).itemsize)
    min_itemsize = min(in_bytes,
                       jnp.dtype(inv_feats.dtype).itemsize,
                       jnp.dtype(equi_feats.dtype).itemsize)
    row_align = 8 * max(1, 4 // min_itemsize)      # 8 for f32, 16 for bf16 tiles

    # ---- hardware-aware VMEM budget (64 MiB v7x vs 128 MiB v5e/v6e) -------
    try:
        vmem_cap = int(pltpu.get_tpu_info().vmem_capacity_bytes)
    except Exception:                              # pragma: no cover
        vmem_cap = 64 * 1024 * 1024                # conservative: v7x per-core
    vmem_budget = int(0.6 * vmem_cap)

    n_weight_elems = 2 * F * F + (D + F) * (D + F)
    weight_bytes = in_bytes * n_weight_elems + 4 * (D + F)

    def vmem_estimate(rows):
        io = 2 * rows * (D + 3 * F) * (in_bytes + out_bytes)   # dbl-buffered tiles
        scratch = 4 * rows * (8 * F + 2 * (D + F))             # f32 temporaries
        return io + 2 * weight_bytes + scratch

    # ---- row tile: >=2 tiles when possible (v7x has 2 TCs), VMEM-bounded ---
    tm = max(row_align, (tm // row_align) * row_align)
    tm = min(tm, _round_up(M, row_align))
    tm = min(tm, max(row_align, _round_up(pl.cdiv(M, 2), row_align)))
    while tm > row_align and vmem_estimate(tm) > vmem_budget:
        tm = max(row_align, ((tm // 2) // row_align) * row_align)
    m_pad = _round_up(M, tm)
    grid = m_pad // tm

    # ---- inputs: cast (for bf16 MXU) BEFORE the transpose, then pad --------
    inv2 = inv_feats.reshape(M, D)
    equi_bnfc = equi_feats
    if inv2.dtype != mxu_dtype:
        inv2 = inv2.astype(mxu_dtype)
    if equi_bnfc.dtype != mxu_dtype:
        equi_bnfc = equi_bnfc.astype(mxu_dtype)
    # TODO(synk): keep a coords-leading [3, M, F] equi layout end-to-end in
    # the model so this HBM round trip disappears.
    equi2 = jnp.transpose(equi_bnfc, (3, 0, 1, 2)).reshape(3, M, F)
    if m_pad != M:
        inv2 = jnp.pad(inv2, ((0, m_pad - M), (0, 0)))
        equi2 = jnp.pad(equi2, ((0, 0), (0, m_pad - M), (0, 0)))

    # ---- weights: cast + split once in the wrapper -------------------------
    w_equi_m = w_equi.astype(mxu_dtype)
    w_inv_m = w_inv.astype(mxu_dtype)
    b_f32 = b_inv.astype(jnp.float32)
    w_eq_a = w_equi_m[:, :F]                       # equi half of equi_proj
    w_eq_n = w_equi_m[:, F:]                       # norm half of equi_proj

    weight_specs = [pl.BlockSpec((F, F), lambda i: (0, 0)),
                    pl.BlockSpec((F, F), lambda i: (0, 0))]
    fuse_inv = (D % 128 == 0)                      # lane-aligned split in-kernel
    if fuse_inv:
        kern = functools.partial(_gated_equi_kernel_fused, eps=eps,
                                 d_model=D, mxu_dtype=mxu_dtype)
        weight_args = (w_eq_a, w_eq_n, w_inv_m[:D, :], w_inv_m[D:, :], b_f32)
        weight_specs += [pl.BlockSpec((D, D + F), lambda i: (0, 0)),
                         pl.BlockSpec((F, D + F), lambda i: (0, 0)),
                         pl.BlockSpec((1, D + F), lambda i: (0, 0))]
    else:
        kern = functools.partial(_gated_equi_kernel_split, eps=eps,
                                 mxu_dtype=mxu_dtype)
        weight_args = (w_eq_a, w_eq_n,
                       w_inv_m[:D, :D], w_inv_m[:D, D:],
                       w_inv_m[D:, :D], w_inv_m[D:, D:],
                       b_f32[:, :D], b_f32[:, D:])
        weight_specs += [pl.BlockSpec((D, D), lambda i: (0, 0)),
                         pl.BlockSpec((D, F), lambda i: (0, 0)),
                         pl.BlockSpec((F, D), lambda i: (0, 0)),
                         pl.BlockSpec((F, F), lambda i: (0, 0)),
                         pl.BlockSpec((1, D), lambda i: (0, 0)),
                         pl.BlockSpec((1, F), lambda i: (0, 0))]

    # Advisory cost estimate so XLA schedules the surrounding graph sensibly.
    flops = (2 * (3 * m_pad) * F * (2 * F)         # equivariant projection
             + 2 * m_pad * (D + F) * (D + F)       # invariant projection
             + 10 * m_pad * F)                     # norms + gating
    bytes_accessed = (in_bytes * m_pad * (D + 3 * F)
                      + out_bytes * m_pad * (D + 3 * F)
                      + weight_bytes)
    cost = pl.CostEstimate(flops=int(flops), transcendentals=int(m_pad * F),
                           bytes_accessed=int(bytes_accessed))

    vmem_limit = int(min(max(2 * vmem_estimate(tm), 16 * 1024 * 1024),
                         int(0.85 * vmem_cap)))

    inv_out, equi_out = pl.pallas_call(
        kern,
        out_shape=(jax.ShapeDtypeStruct((m_pad, D), inv_feats.dtype),
                   jax.ShapeDtypeStruct((3, m_pad, F), equi_feats.dtype)),
        grid=(grid,),
        in_specs=[pl.BlockSpec((tm, D), lambda i: (i, 0)),
                  pl.BlockSpec((3, tm, F), lambda i: (0, i, 0))] + weight_specs,
        out_specs=(pl.BlockSpec((tm, D), lambda i: (i, 0)),
                   pl.BlockSpec((3, tm, F), lambda i: (0, i, 0))),
        compiler_params=pltpu.CompilerParams(
            dimension_semantics=("parallel",),
            vmem_limit_bytes=vmem_limit),
        cost_estimate=cost,
    )(inv2, equi2, *weight_args)

    inv_out = inv_out[:M].reshape(B, N, D)
    equi_out = jnp.transpose(equi_out[:, :M].reshape(3, B, N, F), (1, 2, 3, 0))
    return inv_out, equi_out


def _reference(inv_feats, equi_feats, w_equi, w_inv, b_inv, eps=1e-5):
    """Pure-JAX mirror of the PyTorch forward, for correctness checking."""
    D = inv_feats.shape[-1]
    F = equi_feats.shape[-2]
    proj = jnp.einsum('bnfc,fg->bngc', equi_feats, w_equi)       # [B,N,2F,3]
    equi_out = proj[:, :, :F, :]
    norms = jnp.linalg.norm(proj[:, :, F:, :], axis=-1) + eps    # [B,N,F]
    cat = jnp.concatenate([inv_feats, norms], axis=-1)
    inv_proj = cat @ w_inv + b_inv[0]
    inv_out = inv_proj[..., :D]
    gate = inv_proj[..., D:]
    return inv_out, equi_out * gate[..., None]


if __name__ == "__main__":
    eps = 1e-5
    key = jax.random.PRNGKey(0)
    (k_inv, k_equi, k_we, k_wi, k_bi,
     k2_inv, k2_equi, k2_we, k2_wi, k2_bi) = jax.random.split(key, 10)

    # ---- test 1: module's small dims, f32 MXU path (strict check) ----------
    B, N, D, F = 2, 8, 32, 16
    inv_feats = jax.random.normal(k_inv, (B, N, D), dtype=jnp.float32)
    equi_feats = jax.random.normal(k_equi, (B, N, F, 3), dtype=jnp.float32)
    w_equi = jax.random.normal(k_we, (F, 2 * F), dtype=jnp.float32) / jnp.sqrt(F)
    w_inv = jax.random.normal(k_wi, (D + F, D + F), dtype=jnp.float32) / jnp.sqrt(D + F)
    b_inv = jax.random.normal(k_bi, (1, D + F), dtype=jnp.float32) * 0.01

    inv_out, equi_out = gated_equi_update(inv_feats, equi_feats, w_equi,
                                          w_inv, b_inv, eps=eps)
    jax.block_until_ready((inv_out, equi_out))
    ref_inv, ref_equi = _reference(inv_feats, equi_feats, w_equi, w_inv, b_inv, eps)
    assert inv_out.shape == (B, N, D) and equi_out.shape == (B, N, F, 3)
    assert jnp.allclose(inv_out, ref_inv, atol=1e-4, rtol=1e-4)
    assert jnp.allclose(equi_out, ref_equi, atol=1e-4, rtol=1e-4)

    # ---- test 2: same data via the bf16-MXU path (f32 accumulation) --------
    inv_out16, equi_out16 = gated_equi_update(inv_feats, equi_feats, w_equi,
                                              w_inv, b_inv, eps=eps,
                                              mxu_dtype=jnp.bfloat16)
    jax.block_until_ready((inv_out16, equi_out16))
    assert jnp.allclose(inv_out16, ref_inv, atol=1.5e-1, rtol=1e-1)
    assert jnp.allclose(equi_out16, ref_equi, atol=1.5e-1, rtol=1e-1)

    # ---- test 3: 128-aligned dims -> fused lane-aligned inv projection -----
    B3, N3, D3, F3 = 2, 24, 128, 128
    inv3 = jax.random.normal(k2_inv, (B3, N3, D3), dtype=jnp.float32)
    equi3 = jax.random.normal(k2_equi, (B3, N3, F3, 3), dtype=jnp.float32)
    w_equi3 = jax.random.normal(k2_we, (F3, 2 * F3), dtype=jnp.float32) / jnp.sqrt(F3)
    w_inv3 = jax.random.normal(k2_wi, (D3 + F3, D3 + F3),
                               dtype=jnp.float32) / jnp.sqrt(D3 + F3)
    b_inv3 = jax.random.normal(k2_bi, (1, D3 + F3), dtype=jnp.float32) * 0.01

    inv_out3, equi_out3 = gated_equi_update(inv3, equi3, w_equi3, w_inv3,
                                            b_inv3, eps=eps)
    jax.block_until_ready((inv_out3, equi_out3))
    ref_inv3, ref_equi3 = _reference(inv3, equi3, w_equi3, w_inv3, b_inv3, eps)
    # modest tolerance: XLA reference vs Mosaic MXU pass decomposition for f32
    assert jnp.allclose(inv_out3, ref_inv3, atol=2e-2, rtol=2e-2)
    assert jnp.allclose(equi_out3, ref_equi3, atol=2e-2, rtol=2e-2)

    print("KERNEL_OK")
</pallas_src>

<mosaic_0001>
module attributes {stable_mosaic.version = 11 : i64} {
  func.func @_gated_equi_kernel_split(%arg0: i32, %arg1: memref<8x32xf32, #tpu.memory_space<vmem>>, %arg2: memref<3x8x16xf32, #tpu.memory_space<vmem>>, %arg3: memref<16x16xf32, #tpu.memory_space<vmem>>, %arg4: memref<16x16xf32, #tpu.memory_space<vmem>>, %arg5: memref<32x32xf32, #tpu.memory_space<vmem>>, %arg6: memref<32x16xf32, #tpu.memory_space<vmem>>, %arg7: memref<16x32xf32, #tpu.memory_space<vmem>>, %arg8: memref<16x16xf32, #tpu.memory_space<vmem>>, %arg9: memref<1x32xf32, #tpu.memory_space<vmem>>, %arg10: memref<1x16xf32, #tpu.memory_space<vmem>>, %arg11: memref<8x32xf32, #tpu.memory_space<vmem>>, %arg12: memref<3x8x16xf32, #tpu.memory_space<vmem>>) attributes {dimension_semantics = [#tpu.dimension_semantics<parallel>], iteration_bounds = array<i64: 2>, scalar_prefetch = 0 : i64, scratch_operands = 0 : i64, tpu.core_type = #tpu.core_type<tc>, window_params = [{transform_indices = @transform_0, window_bounds = array<i64: 8, 32>}, {transform_indices = @transform_1, window_bounds = array<i64: 3, 8, 16>}, {pipeline_mode = #tpu.pipeline_mode<synchronous>, transform_indices = @transform_2, window_bounds = array<i64: 16, 16>}, {pipeline_mode = #tpu.pipeline_mode<synchronous>, transform_indices = @transform_3, window_bounds = array<i64: 16, 16>}, {pipeline_mode = #tpu.pipeline_mode<synchronous>, transform_indices = @transform_4, window_bounds = array<i64: 32, 32>}, {pipeline_mode = #tpu.pipeline_mode<synchronous>, transform_indices = @transform_5, window_bounds = array<i64: 32, 16>}, {pipeline_mode = #tpu.pipeline_mode<synchronous>, transform_indices = @transform_6, window_bounds = array<i64: 16, 32>}, {pipeline_mode = #tpu.pipeline_mode<synchronous>, transform_indices = @transform_7, window_bounds = array<i64: 16, 16>}, {pipeline_mode = #tpu.pipeline_mode<synchronous>, transform_indices = @transform_8, window_bounds = array<i64: 1, 32>}, {pipeline_mode = #tpu.pipeline_mode<synchronous>, transform_indices = @transform_9, window_bounds = array<i64: 1, 16>}, {transform_indices = @transform_10, window_bounds = array<i64: 8, 32>}, {transform_indices = @transform_11, window_bounds = array<i64: 3, 8, 16>}]} {
    %c0 = arith.constant 0 : index
    %c0_0 = arith.constant 0 : index
    %c0_1 = arith.constant 0 : index
    %0 = vector.load %arg2[%c0, %c0_0, %c0_1] : memref<3x8x16xf32, #tpu.memory_space<vmem>>, vector<3x8x16xf32>
    %1 = vector.shape_cast %0 : vector<3x8x16xf32> to vector<24x16xf32>
    %c0_2 = arith.constant 0 : index
    %c0_3 = arith.constant 0 : index
    %2 = vector.load %arg4[%c0_2, %c0_3] : memref<16x16xf32, #tpu.memory_space<vmem>>, vector<16x16xf32>
    %cst = arith.constant dense<0.000000e+00> : vector<24x16xf32>
    %3 = tpu.matmul %1, %2, %cst {dimension_numbers = #tpu.dot_dimension_numbers<[1], [0], [0], [1], [0, 0, 1, 1], [], []>} : vector<24x16xf32>, vector<16x16xf32>, vector<24x16xf32> -> vector<24x16xf32>
    %4 = vector.extract_strided_slice %3 {offsets = [0, 0], sizes = [8, 16], strides = [1, 1]} : vector<24x16xf32> to vector<8x16xf32>
    %5 = arith.mulf %4, %4 : vector<8x16xf32>
    %6 = vector.extract_strided_slice %3 {offsets = [8, 0], sizes = [8, 16], strides = [1, 1]} : vector<24x16xf32> to vector<8x16xf32>
    %7 = arith.mulf %6, %6 : vector<8x16xf32>
    %8 = arith.addf %5, %7 : vector<8x16xf32>
    %9 = vector.extract_strided_slice %3 {offsets = [16, 0], sizes = [8, 16], strides = [1, 1]} : vector<24x16xf32> to vector<8x16xf32>
    %10 = arith.mulf %9, %9 : vector<8x16xf32>
    %11 = arith.addf %8, %10 : vector<8x16xf32>
    %12 = math.sqrt %11 : vector<8x16xf32>
    %cst_4 = arith.constant 9.99999974E-6 : f32
    %13 = vector.broadcast %cst_4 : f32 to vector<8x16xf32>
    %14 = arith.addf %12, %13 : vector<8x16xf32>
    %c0_5 = arith.constant 0 : index
    %c0_6 = arith.constant 0 : index
    %15 = vector.load %arg1[%c0_5, %c0_6] : memref<8x32xf32, #tpu.memory_space<vmem>>, vector<8x32xf32>
    %c0_7 = arith.constant 0 : index
    %c0_8 = arith.constant 0 : index
    %16 = vector.load %arg5[%c0_7, %c0_8] : memref<32x32xf32, #tpu.memory_space<vmem>>, vector<32x32xf32>
    %cst_9 = arith.constant dense<0.000000e+00> : vector<8x32xf32>
    %17 = tpu.matmul %15, %16, %cst_9 {dimension_numbers = #tpu.dot_dimension_numbers<[1], [0], [0], [1], [0, 0, 1, 1], [], []>} : vector<8x32xf32>, vector<32x32xf32>, vector<8x32xf32> -> vector<8x32xf32>
    %c0_10 = arith.constant 0 : index
    %c0_11 = arith.constant 0 : index
    %18 = vector.load %arg7[%c0_10, %c0_11] : memref<16x32xf32, #tpu.memory_space<vmem>>, vector<16x32xf32>
    %cst_12 = arith.constant dense<0.000000e+00> : vector<8x32xf32>
    %19 = tpu.matmul %14, %18, %cst_12 {dimension_numbers = #tpu.dot_dimension_numbers<[1], [0], [0], [1], [0, 0, 1, 1], [], []>} : vector<8x16xf32>, vector<16x32xf32>, vector<8x32xf32> -> vector<8x32xf32>
    %20 = arith.addf %17, %19 : vector<8x32xf32>
    %c0_13 = arith.constant 0 : index
    %c0_14 = arith.constant 0 : index
    %21 = vector.load %arg9[%c0_13, %c0_14] : memref<1x32xf32, #tpu.memory_space<vmem>>, vector<1x32xf32>
    %22 = vector.broadcast %21 : vector<1x32xf32> to vector<8x32xf32>
    %23 = arith.addf %20, %22 : vector<8x32xf32>
    %c0_15 = arith.constant 0 : index
    %c0_16 = arith.constant 0 : index
    %24 = vector.load %arg6[%c0_15, %c0_16] : memref<32x16xf32, #tpu.memory_space<vmem>>, vector<32x16xf32>
    %cst_17 = arith.constant dense<0.000000e+00> : vector<8x16xf32>
    %25 = tpu.matmul %15, %24, %cst_17 {dimension_numbers = #tpu.dot_dimension_numbers<[1], [0], [0], [1], [0, 0, 1, 1], [], []>} : vector<8x32xf32>, vector<32x16xf32>, vector<8x16xf32> -> vector<8x16xf32>
    %c0_18 = arith.constant 0 : index
    %c0_19 = arith.constant 0 : index
    %26 = vector.load %arg8[%c0_18, %c0_19] : memref<16x16xf32, #tpu.memory_space<vmem>>, vector<16x16xf32>
    %cst_20 = arith.constant dense<0.000000e+00> : vector<8x16xf32>
    %27 = tpu.matmul %14, %26, %cst_20 {dimension_numbers = #tpu.dot_dimension_numbers<[1], [0], [0], [1], [0, 0, 1, 1], [], []>} : vector<8x16xf32>, vector<16x16xf32>, vector<8x16xf32> -> vector<8x16xf32>
    %28 = arith.addf %25, %27 : vector<8x16xf32>
    %c0_21 = arith.constant 0 : index
    %c0_22 = arith.constant 0 : index
    %29 = vector.load %arg10[%c0_21, %c0_22] : memref<1x16xf32, #tpu.memory_space<vmem>>, vector<1x16xf32>
    %30 = vector.broadcast %29 : vector<1x16xf32> to vector<8x16xf32>
    %31 = arith.addf %28, %30 : vector<8x16xf32>
    %c0_23 = arith.constant 0 : index
    %c0_24 = arith.constant 0 : index
    %32 = vector.load %arg11[%c0_23, %c0_24] : memref<8x32xf32, #tpu.memory_space<vmem>>, vector<8x32xf32>
    tpu.vector_store %arg11[%c0_23, %c0_24], %23 {strides = array<i32>} : memref<8x32xf32, #tpu.memory_space<vmem>>, vector<8x32xf32>,
    %c0_25 = arith.constant 0 : index
    %c0_26 = arith.constant 0 : index
    %33 = vector.load %arg3[%c0_25, %c0_26] : memref<16x16xf32, #tpu.memory_space<vmem>>, vector<16x16xf32>
    %cst_27 = arith.constant dense<0.000000e+00> : vector<24x16xf32>
    %34 = tpu.matmul %1, %33, %cst_27 {dimension_numbers = #tpu.dot_dimension_numbers<[1], [0], [0], [1], [0, 0, 1, 1], [], []>} : vector<24x16xf32>, vector<16x16xf32>, vector<24x16xf32> -> vector<24x16xf32>
    %35 = vector.extract_strided_slice %34 {offsets = [0, 0], sizes = [8, 16], strides = [1, 1]} : vector<24x16xf32> to vector<8x16xf32>
    %36 = arith.mulf %35, %31 : vector<8x16xf32>
    %c0_28 = arith.constant 0 : index
    %c0_29 = arith.constant 0 : index
    %c0_30 = arith.constant 0 : index
    %37 = vector.load %arg12[%c0_28, %c0_29, %c0_30] : memref<3x8x16xf32, #tpu.memory_space<vmem>>, vector<1x8x16xf32>
    %38 = vector.shape_cast %37 : vector<1x8x16xf32> to vector<8x16xf32>
    %39 = vector.shape_cast %36 : vector<8x16xf32> to vector<1x8x16xf32>
    tpu.vector_store %arg12[%c0_28, %c0_29, %c0_30], %39 {strides = array<i32>} : memref<3x8x16xf32, #tpu.memory_space<vmem>>, vector<1x8x16xf32>,
    %40 = vector.extract_strided_slice %34 {offsets = [8, 0], sizes = [8, 16], strides = [1, 1]} : vector<24x16xf32> to vector<8x16xf32>
    %41 = arith.mulf %40, %31 : vector<8x16xf32>
    %c1 = arith.constant 1 : index
    %c0_31 = arith.constant 0 : index
    %c0_32 = arith.constant 0 : index
    %42 = vector.load %arg12[%c1, %c0_31, %c0_32] : memref<3x8x16xf32, #tpu.memory_space<vmem>>, vector<1x8x16xf32>
    %43 = vector.shape_cast %42 : vector<1x8x16xf32> to vector<8x16xf32>
    %44 = vector.shape_cast %41 : vector<8x16xf32> to vector<1x8x16xf32>
    tpu.vector_store %arg12[%c1, %c0_31, %c0_32], %44 {strides = array<i32>} : memref<3x8x16xf32, #tpu.memory_space<vmem>>, vector<1x8x16xf32>,
    %45 = vector.extract_strided_slice %34 {offsets = [16, 0], sizes = [8, 16], strides = [1, 1]} : vector<24x16xf32> to vector<8x16xf32>
    %46 = arith.mulf %45, %31 : vector<8x16xf32>
    %c2 = arith.constant 2 : index
    %c0_33 = arith.constant 0 : index
    %c0_34 = arith.constant 0 : index
    %47 = vector.load %arg12[%c2, %c0_33, %c0_34] : memref<3x8x16xf32, #tpu.memory_space<vmem>>, vector<1x8x16xf32>
    %48 = vector.shape_cast %47 : vector<1x8x16xf32> to vector<8x16xf32>
    %49 = vector.shape_cast %46 : vector<8x16xf32> to vector<1x8x16xf32>
    tpu.vector_store %arg12[%c2, %c0_33, %c0_34], %49 {strides = array<i32>} : memref<3x8x16xf32, #tpu.memory_space<vmem>>, vector<1x8x16xf32>,
    return
  }
  func.func @transform_0(%arg0: i32) -> (i32, i32) {
    %c0_i32 = arith.constant 0 : i32
    %c0_i32_0 = arith.constant 0 : i32
    return %arg0, %c0_i32 : i32, i32
  }
  func.func @transform_1(%arg0: i32) -> (i32, i32, i32) {
    %c0_i32 = arith.constant 0 : i32
    %c0_i32_0 = arith.constant 0 : i32
    %c0_i32_1 = arith.constant 0 : i32
    return %c0_i32, %arg0, %c0_i32_0 : i32, i32, i32
  }
  func.func @transform_2(%arg0: i32) -> (i32, i32) {
    %c0_i32 = arith.constant 0 : i32
    %c0_i32_0 = arith.constant 0 : i32
    %c0_i32_1 = arith.constant 0 : i32
    return %c0_i32, %c0_i32_0 : i32, i32
  }
  func.func @transform_3(%arg0: i32) -> (i32, i32) {
    %c0_i32 = arith.constant 0 : i32
    %c0_i32_0 = arith.constant 0 : i32
    %c0_i32_1 = arith.constant 0 : i32
    return %c0_i32, %c0_i32_0 : i32, i32
  }
  func.func @transform_4(%arg0: i32) -> (i32, i32) {
    %c0_i32 = arith.constant 0 : i32
    %c0_i32_0 = arith.constant 0 : i32
    %c0_i32_1 = arith.constant 0 : i32
    return %c0_i32, %c0_i32_0 : i32, i32
  }
  func.func @transform_5(%arg0: i32) -> (i32, i32) {
    %c0_i32 = arith.constant 0 : i32
    %c0_i32_0 = arith.constant 0 : i32
    %c0_i32_1 = arith.constant 0 : i32
    return %c0_i32, %c0_i32_0 : i32, i32
  }
  func.func @transform_6(%arg0: i32) -> (i32, i32) {
    %c0_i32 = arith.constant 0 : i32
    %c0_i32_0 = arith.constant 0 : i32
    %c0_i32_1 = arith.constant 0 : i32
    return %c0_i32, %c0_i32_0 : i32, i32
  }
  func.func @transform_7(%arg0: i32) -> (i32, i32) {
    %c0_i32 = arith.constant 0 : i32
    %c0_i32_0 = arith.constant 0 : i32
    %c0_i32_1 = arith.constant 0 : i32
    return %c0_i32, %c0_i32_0 : i32, i32
  }
  func.func @transform_8(%arg0: i32) -> (i32, i32) {
    %c0_i32 = arith.constant 0 : i32
    %c0_i32_0 = arith.constant 0 : i32
    %c0_i32_1 = arith.constant 0 : i32
    return %c0_i32, %c0_i32_0 : i32, i32
  }
  func.func @transform_9(%arg0: i32) -> (i32, i32) {
    %c0_i32 = arith.constant 0 : i32
    %c0_i32_0 = arith.constant 0 : i32
    %c0_i32_1 = arith.constant 0 : i32
    return %c0_i32, %c0_i32_0 : i32, i32
  }
  func.func @transform_10(%arg0: i32) -> (i32, i32) {
    %c0_i32 = arith.constant 0 : i32
    %c0_i32_0 = arith.constant 0 : i32
    return %arg0, %c0_i32 : i32, i32
  }
  func.func @transform_11(%arg0: i32) -> (i32, i32, i32) {
    %c0_i32 = arith.constant 0 : i32
    %c0_i32_0 = arith.constant 0 : i32
    %c0_i32_1 = arith.constant 0 : i32
    return %c0_i32, %arg0, %c0_i32_0 : i32, i32, i32
  }
}

</mosaic_0001>

<bundles_post_ra>
// kernel: tpu_custom_call.1
= control target key start
LH: loop header
LB: loop body
LE: loop exit
PB: predicated region body
PF: predicated region fallthrough
CT: control target
= control target key end

     0   :  { %s2301_s0 = inlined_call_operand.hbm [shape: f32[16,32], index: 0, kind: input, shape index: {}]   ;;  %s2302_s1 = inlined_call_operand.vmem [shape: f32[3,16,16], index: 1, kind: input, shape index: {}]   ;;  %s2303_s2 = inlined_call_operand.hbm [shape: f32[16,16], index: 2, kind: input, shape index: {}]   ;;  %s2304_s3 = inlined_call_operand.hbm [shape: f32[16,16], index: 3, kind: input, shape index: {}]   ;;  %s2305_s4 = inlined_call_operand.hbm [shape: f32[32,32], index: 4, kind: input, shape index: {}]   ;;  %s2306_s5 = inlined_call_operand.vmem [shape: f32[32,16], index: 5, kind: input, shape index: {}]   ;;  %s2307_s6 = inlined_call_operand.hbm [shape: f32[16,32], index: 6, kind: input, shape index: {}]   ;;  %s2308_s7 = inlined_call_operand.hbm [shape: f32[16,16], index: 7, kind: input, shape index: {}]   ;;  %s2309_s8 = inlined_call_operand.vmem [shape: f32[1,32], index: 8, kind: input, shape index: {}]   ;;  %s2310_s9 = inlined_call_operand.vmem [shape: f32[1,16], index: 9, kind: input, shape index: {}]   ;;  %s2311_s10 = inlined_call_operand.hbm [shape: f32[16,32], index: 10, kind: output, shape index: {0}]   ;;  %s2312_s11 = inlined_call_operand.hbm [shape: f32[3,16,16], index: 11, kind: output, shape index: {1}]  }
   0x1   :  { %2327 = sst [smem:[#allocation28_spill]] %s2303_s2 }
   0x2   :  { %2328 = sst [smem:[#allocation29_spill]] %s2309_s8 }
   0x3   :  { %2329 = sst [smem:[#allocation30_spill]] %s2310_s9 }
   0x4   :  { %2330 = sst [smem:[#allocation31_spill]] %s2311_s10 }
   0x5   :  { %2331 = sst [smem:[#allocation32_spill]] %s2312_s11 }
   0x6   :  { %17 = vsyncpa [#allocation3], 0 }
   0x7   :  { %19 = vsyncpa [#allocation3 + $0x1], 0 }
   0x8   :  { %20 = vsyncpa [#allocation7], 0 }
   0x9   :  { %21 = vsyncpa [#allocation10], 0 }
   0xa   :  { %22 = vsyncpa [#allocation13], 0 }
   0xb   :  { %23 = vsyncpa [#allocation4], 0 }
   0xc   :  { %25 = vsyncpa [#allocation4 + $0x1], 0 }
   0xd   :  { %26 = vsyncpa [#allocation16], 0 }
   0xe   :  { %28 = vsyncpa [#allocation16 + $0x1], 0  ;;  %s1882_s17 = smov 0   ;;  %s1884_s18 = smov 0  }
   0xf   :  { %s1886_s19 = smov 0   ;;  %s1888_s20 = smov 0  }
  0x10 LB: > { %2332 = sst [smem:[#allocation23_spill]] %s1792_s17  ;;  %s1903_s21 = sadd.s32 4294967295, %s1804_s20   ;;  %s1804_s20 = sphi %s1888_s20, %s2364_s20   ;;  %s1800_s19 = sphi %s1886_s19, %s2368_s19   ;;  %s1796_s18 = sphi %s1884_s18, %s2367_s18   ;;  %s1792_s17 = sphi %s1882_s17, %s2366_s17  }
  0x11   : > { %s1265_s22 = sadd.s32 4294967294, %s1804_s20   ;;  %s1907_s23 = sadd.s32 1, %s1804_s20  }
  0x12   : > { %2333 = sst [smem:[#allocation24_spill]] %s1907_s23  ;;  %s41_s24 = sadd.s32 1, %s1800_s19 }
  0x13   : > { %s38_s25 = ssub.s32 %s1804_s20, %s1907_s23  ;;  %p48_p0 = scmp.ne.s32.totalorder %s1800_s19, %s1796_s18 }
  0x14   : > { %p39_p1 = scmp.eq.s32.totalorder %s38_s25, 0  ;;  %p49_p2 = scmp.eq.s32.totalorder %s1804_s20, 0 }
  0x15   : > { %p54_p3 = scmp.ne.s32.totalorder %s1796_s18, %s1792_s17  ;;  %p2317_p4 = scmp.eq.s32.totalorder %s1903_s21, 0 }
  0x16   : > { %s1919_s26 = scalar_select %p39_p1, %s1800_s19, %s41_s24  }
  0x17   : > { %p1921_p5 = por %p49_p2, %p48_p0  ;;  %p1927_p6 = por %p2317_p4, %p54_p3 }
  0x18   : > { %2334 = sst [smem:[#allocation25_spill]] %s1919_s26  ;;  %p272_p7 = scmp.eq.s32.totalorder %s1903_s21, 1 }
  0x19   : > { %s2335_s27 = scalar_select %p1921_p5, 1, 0 }
  0x1a   : > { %s2336_s28 = scalar_select %p1927_p6, 1, 0 }
  0x1b   : > { %p278_p8 = scmp.eq.s32.totalorder %s1265_s22, 1  ;;  %p1266_p9 = scmp.ge.s32.totalorder %s1804_s20, 1 }
  0x1c   : > { %p311_p10 = scmp.lt.s32.totalorder %s1804_s20, 3  ;;  %p1934_p11 = por %p272_p7, %p48_p0 }
  0x1d   : > { %p1938_p12 = por %p278_p8, %p54_p3  ;;  %s1806_s13 = smov [#allocation6]  }
  0x1e   : > { %s2337_s29 = scalar_select %p1934_p11, 1, 0 }
  0x1f   : > { %s2339_s30 = scalar_select %p1938_p12, 1, 0 }
  0x20   : > { %2338 = sst [smem:[#allocation26_spill]] %s2337_s29  ;;  %p1942_p13 = pnand %p1266_p9, %p311_p10 }
  0x21   : > { %2340 = sst [smem:[#allocation27_spill]] %s2339_s30  ;;  %s323_s14 = sshll.u32 %s1806_s13, 4  ;;  %s324_s14 = int_to_ptr.vmem [resolvable:$true] %s323_s14 }
  0x22   : > { %s2341_s12 = scalar_select %p1942_p13, 1, 0 }
  0x23   : > { %p1445_p1 = pneg %p1942_p13  ;;  %s1807_s16 = smov [#allocation9]  }
  0x24   : > { %s349_s22 = sshll.u32 %s1807_s16, 4  ;;  %s2343_s2 = sld [smem:[#allocation28_spill]]  ;;  %s1954_s22 = int_to_ptr.vmem [resolvable:$true] %s349_s22 }
  0x25   : > { %p1950_p2 = pnand %p1445_p1, %p2317_p4 }
  0x27   : > { %p1964_p3 = pneg %p1950_p2 }
  0x2a   : > { %s1526_s26 = scalar_lea.hbm %s2343_s2, 256 }
  0x2b   : > { %p1527_p0 = scmp.ne.s32.totalorder %s2343_s2, %s1526_s26  ;;  %p1533_p9 = scmp.lt.u32.totalorder %s1526_s26, %s2343_s2 }
  0x2d   : > { %p1529_p7 = pnand %p1964_p3, %p1527_p0 }
  0x2f   : > { %p1530_p8 = pneg %p1529_p7 }
  0x31   : > { %p1535_p10 = pnand %p1533_p9, %p1530_p8 }
  0x33   : > { %1538 = shalt.err (!%p1535_p10)
}
  0x34   : > { %s1539_s24 = scalar_lea.vmem %s324_s14, 256  ;;  %p1547_p11 = scmp.lt.s32.totalorder %s324_s14, %s324_s14 }
  0x35   : > { %p1540_p1 = scmp.ne.s32.totalorder %s324_s14, %s1539_s24  ;;  %p1548_p6 = scmp.lt.s32.totalorder %s1539_s24, %s1539_s24 }
  0x37   : > { %p1542_p4 = pnand %p1540_p1, %p1964_p3  ;;  %p1549_p13 = por %p1548_p6, %p1547_p11 }
  0x39   : > { %p1543_p12 = pneg %p1542_p4 }
  0x3b   : > { %p1550_p5 = pnand %p1549_p13, %p1543_p12 }
  0x3d   : > { %1553 = shalt.err (!%p1550_p5)
}
  0x3e   : > { %s1808_s23 = smov 128   ;;  %s1809_s30 = smov 8  }
  0x3f   : > { %1448 = dma.hbm_to_vmem [thread:$0]  (!%p1950_p2), %s2343_s2, 256, %s324_s14, [#allocation7], %s1808_s23, %s1808_s23, %s1809_s30  }
  0x40   : > { %s1554_s11 = scalar_lea.hbm %s2305_s4, 512 }
  0x41   : > { %p1555_p4 = scmp.ne.s32.totalorder %s2305_s4, %s1554_s11  ;;  %p1561_p11 = scmp.lt.u32.totalorder %s1554_s11, %s2305_s4 }
  0x43   : > { %p1557_p5 = pnand %p1555_p4, %p1964_p3 }
  0x45   : > { %p1558_p6 = pneg %p1557_p5 }
  0x47   : > { %p1563_p12 = pnand %p1561_p11, %p1558_p6 }
  0x49   : > { %1566 = shalt.err (!%p1563_p12)
}
  0x4a   : > { %s1567_s14 = scalar_lea.vmem %s1954_s22, 512  ;;  %p1575_p8 = scmp.lt.s32.totalorder %s1954_s22, %s1954_s22 }
  0x4b   : > { %p1568_p13 = scmp.ne.s32.totalorder %s1954_s22, %s1567_s14  ;;  %p1576_p9 = scmp.lt.s32.totalorder %s1567_s14, %s1567_s14 }
  0x4d   : > { %p1570_p0 = pnand %p1568_p13, %p1964_p3  ;;  %p1577_p10 = por %p1576_p9, %p1575_p8 }
  0x4f   : > { %p1571_p7 = pneg %p1570_p0 }
  0x51   : > { %p1578_p1 = pnand %p1577_p10, %p1571_p7 }
  0x53   : > { %1581 = shalt.err (!%p1578_p1)
}
  0x54   : > { %1454 = dma.hbm_to_vmem [thread:$0]  (!%p1950_p2), %s2305_s4, 512, %s1954_s22, [#allocation10], %s1808_s23, %s1808_s23, %s1809_s30  }
  0x55   : > { %s1810_s11 = smov [#allocation8]   ;;  %s1811_s17 = smov [#allocation11]  }
  0x56   : > { %s336_s29 = sshll.u32 %s1810_s11, 4  ;;  %s365_s26 = sshll.u32 %s1811_s17, 4  ;;  %s337_s29 = int_to_ptr.vmem [resolvable:$true] %s336_s29  ;;  %s366_s26 = int_to_ptr.vmem [resolvable:$true] %s365_s26 }
  0x57   : > { %s1582_s24 = scalar_lea.hbm %s2304_s3, 256 }
  0x58   : > { %p1583_p4 = scmp.ne.s32.totalorder %s2304_s3, %s1582_s24  ;;  %p1589_p11 = scmp.lt.u32.totalorder %s1582_s24, %s2304_s3 }
  0x5a   : > { %p1585_p5 = pnand %p1583_p4, %p1964_p3 }
  0x5c   : > { %p1586_p6 = pneg %p1585_p5 }
  0x5e   : > { %p1591_p12 = pnand %p1589_p11, %p1586_p6 }
  0x60   : > { %1594 = shalt.err (!%p1591_p12)
}
  0x61   : > { %s1595_s22 = scalar_lea.vmem %s337_s29, 256  ;;  %p1603_p8 = scmp.lt.s32.totalorder %s337_s29, %s337_s29 }
  0x62   : > { %p1596_p13 = scmp.ne.s32.totalorder %s337_s29, %s1595_s22  ;;  %p1604_p9 = scmp.lt.s32.totalorder %s1595_s22, %s1595_s22 }
  0x64   : > { %p1598_p0 = pnand %p1596_p13, %p1964_p3  ;;  %p1605_p10 = por %p1604_p9, %p1603_p8 }
  0x66   : > { %p1599_p7 = pneg %p1598_p0 }
  0x68   : > { %p1606_p1 = pnand %p1605_p10, %p1599_p7 }
  0x6a   : > { %1609 = shalt.err (!%p1606_p1)
}
  0x6b   : > { %1451 = dma.hbm_to_vmem [thread:$0]  (!%p1950_p2), %s2304_s3, 256, %s337_s29, [#allocation7], %s1808_s23, %s1808_s23, %s1809_s30  }
  0x6c   : > { %s1610_s17 = scalar_lea.hbm %s2307_s6, 256 }
  0x6d   : > { %p1611_p4 = scmp.ne.s32.totalorder %s2307_s6, %s1610_s17  ;;  %p1617_p11 = scmp.lt.u32.totalorder %s1610_s17, %s2307_s6 }
  0x6f   : > { %p1613_p5 = pnand %p1611_p4, %p1964_p3 }
  0x71   : > { %p1614_p6 = pneg %p1613_p5 }
  0x73   : > { %p1619_p12 = pnand %p1617_p11, %p1614_p6 }
  0x75   : > { %1622 = shalt.err (!%p1619_p12)
}
  0x76   : > { %s1623_s9 = scalar_lea.vmem %s366_s26, 256  ;;  %p1631_p8 = scmp.lt.s32.totalorder %s366_s26, %s366_s26 }
  0x77   : > { %p1624_p13 = scmp.ne.s32.totalorder %s366_s26, %s1623_s9  ;;  %p1632_p9 = scmp.lt.s32.totalorder %s1623_s9, %s1623_s9 }
  0x79   : > { %p1626_p0 = pnand %p1624_p13, %p1964_p3  ;;  %p1633_p10 = por %p1632_p9, %p1631_p8 }
  0x7b   : > { %p1627_p7 = pneg %p1626_p0 }
  0x7d   : > { %p1634_p1 = pnand %p1633_p10, %p1627_p7 }
  0x7f   : > { %1637 = shalt.err (!%p1634_p1)
}
  0x80   : > { %1457 = dma.hbm_to_vmem [thread:$0]  (!%p1950_p2), %s2307_s6, 256, %s366_s26, [#allocation10], %s1808_s23, %s1808_s23, %s1809_s30  }
  0x81   : > { %s1812_s2 = smov [#allocation12]   ;;  %s1638_s17 = scalar_lea.hbm %s2308_s7, 256 }
  0x82   : > { %s378_s8 = sshll.u32 %s1812_s2, 4  ;;  %p1639_p4 = scmp.ne.s32.totalorder %s2308_s7, %s1638_s17  ;;  %s379_s8 = int_to_ptr.vmem [resolvable:$true] %s378_s8 }
  0x83   : > { %p1645_p11 = scmp.lt.u32.totalorder %s1638_s17, %s2308_s7 }
  0x84   : > { %p1641_p5 = pnand %p1639_p4, %p1964_p3 }
  0x86   : > { %p1642_p6 = pneg %p1641_p5 }
  0x88   : > { %p1647_p12 = pnand %p1645_p11, %p1642_p6 }
  0x8a   : > { %1650 = shalt.err (!%p1647_p12)
}
  0x8b   : > { %s1651_s26 = scalar_lea.vmem %s379_s8, 256  ;;  %p1659_p8 = scmp.lt.s32.totalorder %s379_s8, %s379_s8 }
  0x8c   : > { %p1652_p13 = scmp.ne.s32.totalorder %s379_s8, %s1651_s26  ;;  %p1660_p9 = scmp.lt.s32.totalorder %s1651_s26, %s1651_s26 }
  0x8e   : > { %p1654_p0 = pnand %p1652_p13, %p1964_p3  ;;  %p1661_p10 = por %p1660_p9, %p1659_p8 }
  0x90   : > { %p1655_p7 = pneg %p1654_p0 }
  0x92   : > { %p1662_p1 = pnand %p1661_p10, %p1655_p7 }
  0x94   : > { %1665 = shalt.err (!%p1662_p1)
}
  0x95   : > { %1460 = dma.hbm_to_vmem [thread:$0]  (!%p1950_p2), %s2308_s7, 256, %s379_s8, [#allocation13], %s1808_s23, %s1808_s23, %s1809_s30  }
  0x96   : > { %p2326_p4 = scmp.ge.s32.totalorder %s1804_s20, 2 }
  0x97   : > { %s2076_s13 = sand.u32 (!%p2326_p4), 1, %s1800_s19   ;;  %s1274_s15 = sshll.u32 (!%p2326_p4), %s1804_s20, 7 }
  0x98   : > { %394 = sbr.rel (%p2326_p4) target bundleno = 184 (0xb8), region = 48  ;;  %s1273_s22 = sshll.u32 (!%p2326_p4), %s2076_s13, 3 }
  0x99   : > { %s2083_s11 = scalar_lea.hbm (!%p2326_p4), %s2301_s0, %s1274_s15  ;;  %s402_s23 = scalar_lea.vmem (!%p2326_p4), [#allocation2], %s1273_s22 }
  0x9a   : > { %s409_s30 = sshll.u32 (!%p2326_p4), %s402_s23, 4  ;;  %s399_s8 = scalar_lea.sflag (!%p2326_p4), [#allocation3], %s2076_s13  ;;  %s410_s30 = int_to_ptr.vmem [resolvable:$true] %s409_s30 }
  0x9b   : > { %s1666_s17 = scalar_lea.hbm (!%p2326_p4), %s2083_s11, 128  ;;  %p2345_p3 = scmp.ne.s32.totalorder (!%p2326_p4), %s2335_s27, 0 }
  0x9c   : > { %p1667_p2 = scmp.ne.s32.totalorder (!%p2326_p4), %s2083_s11, %s1666_s17  ;;  %s1670_s24 = scalar_lea.hbm (!%p2326_p4), %s2301_s0, 256 }
  0x9d   : > { %p1671_p11 = scmp.lt.u32.totalorder (!%p2326_p4), %s2083_s11, %s2301_s0  ;;  %p1672_p12 = scmp.lt.u32.totalorder (!%p2326_p4), %s1670_s24, %s1666_s17 }
  0x9e   : > { %p1668_p5 = pnand (!%p2326_p4), %p1667_p2, %p2345_p3  ;;  %p1674_p0 = scmp.lt.u32.totalorder (!%p2326_p4), %s1666_s17, %s2083_s11 }
  0x9f   : > { %p1673_p13 = por %p1672_p12, %p1671_p11 }
  0xa0   : > { %p1669_p6 = pneg %p1668_p5 }
  0xa1   : > { %p1675_p7 = por %p1674_p0, %p1673_p13 }
  0xa3   : > { %p1676_p8 = pnand %p1675_p7, %p1669_p6 }
  0xa5   : > { %1679 = shalt.err (!%p1676_p8)
}
  0xa6   : > { %s1680_s9 = scalar_lea.vmem %s410_s30, 128  ;;  %s1813_s29 = smov [#allocation2]  }
  0xa7   : > { %p1681_p9 = scmp.ne.s32.totalorder %s410_s30, %s1680_s9  ;;  %s1684_s15 = sshll.u32 %s1813_s29, 4  ;;  %s1685_s15 = int_to_ptr.vmem [resolvable:$false] %s1684_s15 }
  0xa8   : > { %s1686_s22 = scalar_lea.vmem %s1685_s15, 256  ;;  %p1687_p2 = scmp.lt.s32.totalorder %s410_s30, %s1685_s15 }
  0xa9   : > { %p1682_p10 = pnand %p1681_p9, %p2345_p3  ;;  %p1688_p5 = scmp.lt.s32.totalorder %s1686_s22, %s1680_s9 }
  0xab   : > { %p1683_p1 = pneg %p1682_p10  ;;  %p1689_p4 = por %p1688_p5, %p1687_p2 }
  0xad   : > { %p1690_p11 = pnand %p1689_p4, %p1683_p1 }
  0xaf   : > { %1693 = shalt.err (!%p1690_p11)
}
  0xb0   : > { %1429 = dma.hbm_to_vmem [thread:$0]  (%p2345_p3), %s2083_s11, 128, %s410_s30, %s399_s8  }
  0xb1   : > { %415 = sbr.rel (!%p2345_p3) target bundleno = 184 (0xb8), region = 56  ;;  %s1275_s10 = sshll.u32 (%p2345_p3), %s1804_s20, 3 }
  0xb2   : > { %s1417_s2 = smul.u32 (%p2345_p3), 24, %s2076_s13  ;;  %s421_s25 = scalar_lea.vmem (%p2345_p3), %s2302_s1, %s1275_s10 }
  0xb3   : > { %v453_v0 = vld [vmem:[%s421_s25] sm:$0xff] (%p2345_p3)  ;;  %v455_v1 = vld [vmem:[%s421_s25 + $0x10] sm:$0xff] (%p2345_p3) }
  0xb4   : > { %v457_v2 = vld [vmem:[%s421_s25 + $0x20] sm:$0xff] (%p2345_p3)  ;;  %s419_s16 = scalar_lea.vmem (%p2345_p3), [#allocation5], %s1417_s2 }
  0xb5   : > { %454 = vst [vmem:[%s419_s16] sm:$0xff] (%p2345_p3), %v453_v0  ;;  %456 = vst [vmem:[%s419_s16 + $0x8] sm:$0xff] (%p2345_p3), %v455_v1 }
  0xb6   : > { %458 = vst [vmem:[%s419_s16 + $0x10] sm:$0xff] (%p2345_p3), %v457_v2 }
  0xb8 PF: > { %p2346_p4 = scmp.ne.s32.totalorder %s2341_s12, 0 }
  0xb9   : > { %s2113_s27 = sand.u32 (!%p2346_p4), 1, %s1796_s18   ;;  %p2347_p3 = scmp.ne.s32.totalorder (!%p2346_p4), %s2336_s28, 0 }
  0xba   : > { %467 = sbr.rel (%p2346_p4) target bundleno = 720 (0x2d0), region = 94  ;;  %s1277_s13 = sshll.u32 (!%p2346_p4), %s2113_s27, 3 }
  0xbb   : > { %s470_s11 = scalar_lea.sflag (!%p2346_p4), [#allocation3], %s2113_s27  ;;  %s2119_s30 = scalar_lea.vmem (!%p2346_p4), [#allocation2], %s1277_s13 }
  0xc1   : > { %1767 = dma.done.wait (%p2347_p3), %s470_s11, 128  }
  0xc2   : > { %1769 = vsyncadd (%p2347_p3), %s470_s11, 4294967168  ;;  %s1418_s12 = smul.u32 24, %s2113_s27  ;;  %p2348_p6 = scmp.eq.s32.totalorder %s1903_s21, 0 }
  0xc4   : > { %s481_s8 = scalar_lea.vmem [#allocation5], %s1418_s12 }
  0xc5   : > { %1771 = dma.done.wait (%p2348_p6), [#allocation7], 512   ;;  %p2349_p12 = pmov %p2348_p6 }
  0xc6   : > { %p2350_p13 = pmov %p2348_p6 }
  0xc7   : > { %1773 = vsyncadd (%p2349_p12), [#allocation7], 4294966784 }
  0xc8   : > { %1775 = dma.done.wait (%p2350_p13), [#allocation10], 768   ;;  %p2351_p0 = pmov %p2348_p6 }
  0xca   : > { %1777 = vsyncadd (%p2351_p0), [#allocation10], 4294966528  ;;  %p2352_p7 = pmov %p2351_p0 }
  0xcb   : > { %p2353_p8 = pmov %p2351_p0 }
  0xcc   : > { %1779 = dma.done.wait (%p2352_p7), [#allocation13], 256  }
  0xcd   : > { %1781 = vsyncadd (%p2353_p8), [#allocation13], 4294967040  ;;  %v1814_v3 = vmov 0.0|0.0   ;;  %vm1815_vm0 = vmmov 0   ;;  %v1816_v4 = vmov 0.0   ;;  %v551_v5 = vld [vmem:[#allocation8] sm:$0xff] }
  0xce   : > { %1391 = vmatprep.subr.bf16.mxu0 %v1814_v3  ;;  %1333 = vmatprep.mubr.msk.f32.mxu0 %vm1815_vm0, %v1816_v4  ;;  %v552_v6 = vld [vmem:[#allocation8 + $0x8] sm:$0xff]  ;;  %v2146_v8 = vld [vmem:[%s481_s8] sm:$0xff]  ;;  %vm553_vm1 = vcmask 130048   ;;  %v661_v11 = vld [vmem:[#allocation11] sm:$0xff]  ;;  %vm736_vm4 = vcmask 261120   ;;  %s2354_s23 = sld [smem:[#allocation29_spill]] }
  0xcf   : > { %1415 = vmatprep.subr.bf16.mxu1 %v1814_v3  ;;  %1339 = vmatprep.mubr.msk.f32.mxu1 %vm1815_vm0, %v1816_v4  ;;  %v1392_v7 = vpack.c.bf16 %v552_v6, %v551_v5  ;;  %v2148_v9 = vld [vmem:[%s481_s8 + $0x10] sm:$0xff]  ;;  %v2158_v10 = vld [vmem:[%s481_s8 + $0x8] sm:$0xff]  ;;  %v662_v12 = vld [vmem:[#allocation11 + $0x8] sm:$0xff]  ;;  %s2355_s17 = sld [smem:[#allocation26_spill]]  ;;  %s1299_s25 = sshll.u32 %s1903_s21, 7 }
  0xd0   : > { %v822_v13 = vld [vmem:[#allocation12] sm:$0xff]  ;;  %v1395_v14 = vpack.c.bf16 %v662_v12, %v661_v11  ;;  %v823_v15 = vld [vmem:[#allocation12 + $0x8] sm:$0xff]  ;;  %v657_v30 = vld [vmem:[#allocation9] sm:$0xff]  ;;  %s540_s16 = scalar_lea.vmem [#allocation14], %s1277_s13  ;;  %s2356_s28 = sld [smem:[#allocation31_spill]] }
  0xd1   : > { %1393 = vmatpush3.bf16.msra.mxu0 %v1392_v7  ;;  %1416 = vmatpush3.bf16.msra.mxu1 %v1392_v7  ;;  %v1404_v16 = vpack.c.bf16 %v823_v15, %v822_v13  ;;  %v658_v31 = vld [vmem:[#allocation9 + $0x8] sm:$0xff]  ;;  %v973_v33 = vld [vmem:[#allocation6] sm:$0xff]  ;;  %v659_v39 = vld [vmem:[#allocation9 + $0x10] sm:$0xff]  ;;  %s1082_s11 = sshll.u32 %s540_s16, 4  ;;  %s1064_s13 = scalar_lea.sflag [#allocation4], %s2113_s27  ;;  %s2217_s11 = int_to_ptr.vmem [resolvable:$true] %s1082_s11 }
  0xd2   : > { %1394 = vmatprep.subr.bf16.mxu1 %v1814_v3  ;;  %1403 = vmatprep.subr.bf16.mxu0 %v1814_v3  ;;  %v974_v34 = vld [vmem:[#allocation6 + $0x8] sm:$0xff]  ;;  %v1398_v37 = vpack.c.bf16 %v658_v31, %v657_v30  ;;  %v660_v40 = vld [vmem:[#allocation9 + $0x18] sm:$0xff]  ;;  %v818_v43 = vld [vmem:[%s2306_s5] sm:$0xff]  ;;  %s1694_s14 = scalar_lea.vmem %s2217_s11, 128  ;;  %s1817_s26 = smov [#allocation14]  }
  0xd3   : > { %v1413_v41 = vpack.c.bf16 %v974_v34, %v973_v33  ;;  %v1401_v42 = vpack.c.bf16 %v660_v40, %v659_v39  ;;  %v819_v44 = vld [vmem:[%s2306_s5 + $0x8] sm:$0xff]  ;;  %v820_v47 = vld [vmem:[%s2306_s5 + $0x10] sm:$0xff]  ;;  %v821_v48 = vld [vmem:[%s2306_s5 + $0x18] sm:$0xff]  ;;  %p1695_p9 = scmp.ne.s32.totalorder %s2217_s11, %s1694_s14  ;;  %s1698_s9 = sshll.u32 %s1817_s26, 4  ;;  %s1699_s9 = int_to_ptr.vmem [resolvable:$false] %s1698_s9 }
  0xd4   : > { %1334 = vmatmul.mubr.msk.f32.vlgmr.msra.gmra.mrb[0].mxu0 %vm553_vm1, %v2146_v8  ;;  %1340 = vmatmul.mubr.msk.f32.vlgmr.msra.gmra.mrb[0].mxu1 %vm553_vm1, %v2148_v9  ;;  %v656_v45 = vld [vmem:[%s2119_s30] sm:$0xff]  ;;  %v1407_v46 = vpack.c.bf16 %v819_v44, %v818_v43  ;;  %v1410_v49 = vpack.c.bf16 %v821_v48, %v820_v47  ;;  %s1700_s29 = scalar_lea.vmem %s1699_s9, 256  ;;  %p1701_p5 = scmp.lt.s32.totalorder %s2217_s11, %s1699_s9 }
  0xd5   : > { %1336 = vmatprep.mubr.msk.f32.mxu0 %vm1815_vm0, %v1816_v4  ;;  %1346 = vmatprep.mubr.msk.f32.mxu1 %vm1815_vm0, %v1816_v4  ;;  %v1289_v57 = vld [vmem:[%s2354_s23] ss:$0 sm:$0xff]  ;;  %p2357_p10 = scmp.ne.s32.totalorder %s2355_s17, 0  ;;  %p1702_p11 = scmp.lt.s32.totalorder %s1700_s29, %s1694_s14 }
  0xd6   : > { %1396 = vmatpush3.bf16.msra.mxu1 %v1395_v14  ;;  %1405 = vmatpush3.bf16.msra.mxu0 %v1404_v16  ;;  %s2215_s24 = scalar_lea.hbm %s2356_s28, %s1299_s25 }
  0xd7   : > { %1397 = vmatprep.subr.bf16.mxu1 %v1814_v3  ;;  %1412 = vmatprep.subr.bf16.mxu0 %v1814_v3  ;;  %p1696_p1 = pnand %p1695_p9, %p2357_p10  ;;  %p1703_p4 = por %p1702_p11, %p1701_p5 }
  0xd8   : > { %1337 = vmatmul.mubr.msk.f32.gmra.mrb[2].mxu0 %vm553_vm1, %v2158_v10 }
  0xd9   : > { %1364 = vmatprep.mubr.msk.f32.mxu0 %vm1815_vm0, %v1816_v4  ;;  %p1697_p2 = pneg %p1696_p1 }
  0xdb   : > { %p1704_p3 = pnand %p1703_p4, %p1697_p2 }
 0x1a7   : > { %v629_v17 = vpop.f32.mrb[0].mxu0  ;;  %v639_v18 = vpop.f32.mrb[0].mxu1 }
 0x1a8   : > { %v1335_v19 = vpop.f32.mrb[1].mxu0  ;;  %v1341_v20 = vpop.f32.mrb[1].mxu1  ;;  %v643_v22 = vmul.f32 %v629_v17, %v629_v17  ;;  %v646_v25 = vmul.f32 %v639_v18, %v639_v18 }
 0x1ab   : > { %v634_v21 = vpop.f32.mrb[2].mxu0 }
 0x1ac   : > { %v644_v23 = vmul.f32 %v634_v21, %v634_v21  ;;  %v1338_v24 = vpop.f32.mrb[3].mxu0 }
 0x1ae   : > { %v645_v26 = vadd.f32 %v644_v23, %v643_v22 }
 0x1b0   : > { %v647_v27 = vadd.f32 %v646_v25, %v645_v26 }
 0x1b2   : > { %1524 = vrsqrt.f32 %v647_v27  ;;  %vm650_vm2 = vcmp.eq.f32.partialorder %v647_v27, inf  ;;  %v653_v32 = vand.u32 2147483648, %v647_v27  ;;  %vm652_vm3 = vcmp.eq.f32.partialorder %v647_v27, 0.0 }
 0x1bc   : > { %v1525_v28 = vpop.eup %1524 }
 0x1bd   : > { %v649_v29 = vmul.f32 %v1525_v28, %v647_v27 }
 0x1bf   : > { %v651_v35 = vsel %vm650_vm2, %v647_v27, %v649_v29 }
 0x1c0   : > { %v654_v36 = vsel %vm652_vm3, %v653_v32, %v651_v35 }
 0x1c1   : > { %v655_v38 = vadd.f32 1e-05, %v654_v36 }
 0x1c3   : > { %1347 = vmatmul.mubr.msk.f32.vlgmr.msra.gmra.mrb[2].mxu1 %vm553_vm1, %v655_v38  ;;  %1365 = vmatmul.mubr.msk.f32.vlgmr.msra.gmra.mrb[4].mxu0 %vm553_vm1, %v655_v38 }
 0x1c4   : > { %1399 = vmatpush3.bf16.msra.mxu1 %v1398_v37  ;;  %1357 = vmatprep.mubr.msk.f32.mxu1 %vm1815_vm0, %v1816_v4 }
 0x1c5   : > { %1400 = vmatprep.subr.bf16.mxu1 %v1814_v3  ;;  %1414 = vmatpush3.bf16.msra.mxu0 %v1413_v41 }
 0x1c6   : > { %1382 = vmatprep.mubr.msk.f32.mxu0 %vm1815_vm0, %v1816_v4 }
 0x1c8   : > { %1402 = vmatpush3.bf16.msra.mxu1 %v1401_v42  ;;  %1383 = vmatmul.mubr.msk.f32.vlgmr.msra.gmra.mrb[6].mxu0 %vm553_vm1, %v2146_v8 }
 0x1c9   : > { %1406 = vmatprep.subr.bf16.mxu1 %v1814_v3  ;;  %1385 = vmatprep.mubr.msk.f32.mxu0 %vm1815_vm0, %v1816_v4 }
 0x1cb   : > { %1358 = vmatmul.mubr.msk.f32.vlgmr.msra.gmra.mrb[4].mxu1 %vm736_vm4, %v656_v45 }
 0x1cc   : > { %1408 = vmatpush3.bf16.msra.mxu1 %v1407_v46  ;;  %1375 = vmatprep.mubr.msk.f32.mxu1 %vm1815_vm0, %v1816_v4 }
 0x1cd   : > { %1409 = vmatprep.subr.bf16.mxu1 %v1814_v3  ;;  %1386 = vmatmul.mubr.msk.f32.gmra.mrb[8].mxu0 %vm553_vm1, %v2158_v10 }
 0x1ce   : > { %1388 = vmatprep.mubr.msk.f32.mxu0 %vm1815_vm0, %v1816_v4 }
 0x1d0   : > { %1411 = vmatpush3.bf16.msra.mxu1 %v1410_v49 }
 0x1d1   : > { %1389 = vmatmul.mubr.msk.f32.gmra.mrb[10].mxu0 %vm553_vm1, %v2148_v9 }
 0x1d3   : > { %1376 = vmatmul.mubr.msk.f32.vlgmr.msra.gmra.mrb[6].mxu1 %vm736_vm4, %v656_v45 }
 0x296   : > { %v732_v50 = vpop.f32.mrb[2].mxu1  ;;  %v890_v51 = vpop.f32.mrb[4].mxu0 }
 0x297   : > { %v1348_v52 = vpop.f32.mrb[3].mxu1  ;;  %v1366_v53 = vpop.f32.mrb[5].mxu0 }
 0x29b   : > { %v1041_v54 = vpop.f32.mrb[6].mxu0 }
 0x29c   : > { %v1384_v55 = vpop.f32.mrb[7].mxu0 }
 0x29e   : > { %v806_v56 = vpop.f32.mrb[4].mxu1 }
 0x29f   : > { %v807_v58 = vadd.f32 %v806_v56, %v732_v50  ;;  %v1359_v59 = vpop.f32.mrb[5].mxu1 }
 0x2a0   : > { %v1046_v60 = vpop.f32.mrb[8].mxu0 }
 0x2a1   : > { %v817_v61 = vadd.f32 %v1289_v57, %v807_v58  ;;  %v1387_v62 = vpop.f32.mrb[9].mxu0 }
 0x2a3   : > { %972 = vst.msk [vmem:[%s540_s16] sm:$0xff] %vm736_vm4, %v817_v61 }
 0x2a4   : > { %v1051_v63 = vpop.f32.mrb[10].mxu0 }
 0x2a5   : > { %1707 = shalt.err (!%p1704_p3)
}
 0x2a6   : > { %s1708_s15 = scalar_lea.hbm %s2215_s24, 128  ;;  %s1712_s10 = scalar_lea.hbm %s2356_s28, 256 }
 0x2a7   : > { %p1709_p6 = scmp.ne.s32.totalorder %s2215_s24, %s1708_s15  ;;  %p1713_p0 = scmp.lt.u32.totalorder %s2215_s24, %s2356_s28 }
 0x2a8   : > { %p1714_p7 = scmp.lt.u32.totalorder %s1712_s10, %s1708_s15  ;;  %p1716_p9 = scmp.lt.u32.totalorder %s1708_s15, %s2215_s24 }
 0x2a9   : > { %p1710_p12 = pnand %p1709_p6, %p2357_p10 }
 0x2aa   : > { %p1715_p8 = por %p1714_p7, %p1713_p0 }
 0x2ab   : > { %p1711_p13 = pneg %p1710_p12 }
 0x2ac   : > { %p1717_p1 = por %p1716_p9, %p1715_p8 }
 0x2ae   : > { %p1718_p2 = pnand %p1717_p1, %p1711_p13 }
 0x2b0   : > { %1721 = shalt.err (!%p1718_p2)
}
 0x2b1   : > { %1441 = dma.vmem_to_hbm [thread:$0]  (%p2357_p10), %s2217_s11, 128, %s2215_s24, %s1064_s13   ;;  %v1390_v0 = vpop.f32.mrb[11].mxu0  ;;  %v960_v1 = vpop.f32.mrb[6].mxu1 }
 0x2b2   : > { %s2358_s14 = sld [smem:[#allocation30_spill]]  ;;  %s547_s26 = scalar_lea.vmem [#allocation15], %s1418_s12  ;;  %v961_v3 = vadd.f32 %v960_v1, %v890_v51  ;;  %v1377_v4 = vpop.f32.mrb[7].mxu1 }
 0x2b3   : > { %s1094_s9 = sshll.u32 %s547_s26, 4  ;;  %s2359_s11 = sld [smem:[#allocation32_spill]]  ;;  %s2247_s9 = int_to_ptr.vmem [resolvable:$true] %s1094_s9 }
 0x2b4   : > { %s1069_s12 = scalar_lea.sflag [#allocation16], %s2113_s27  ;;  %s1722_s13 = scalar_lea.vmem %s2247_s9, 384 }
 0x2b5   : > { %p1723_p5 = scmp.ne.s32.totalorder %s2247_s9, %s1722_s13  ;;  %s1818_s21 = smov [#allocation15]  }
 0x2b6   : > { %s1726_s22 = sshll.u32 %s1818_s21, 4  ;;  %s1727_s22 = int_to_ptr.vmem [resolvable:$false] %s1726_s22 }
 0x2b7   : > { %p1724_p11 = pnand %p1723_p5, %p2357_p10  ;;  %p1729_p3 = scmp.lt.s32.totalorder %s2247_s9, %s1727_s22 }
 0x2b8   : > { %v1292_v2 = vld [vmem:[%s2358_s14] ss:$0 sm:$0xff] }
 0x2b9   : > { %v971_v5 = vadd.f32 %v1292_v2, %v961_v3  ;;  %s2254_s24 = scalar_lea.hbm %s2359_s11, %s1299_s25  ;;  %p1725_p4 = pneg %p1724_p11 }
 0x2ba   : > { %s1728_s25 = scalar_lea.vmem %s1727_s22, 768 }
 0x2bb   : > { %v1055_v6 = vmul.f32 %v1041_v54, %v971_v5  ;;  %v1057_v7 = vmul.f32 %v1046_v60, %v971_v5  ;;  %v1060_v8 = vmul.f32 %v1051_v63, %v971_v5  ;;  %p1730_p6 = scmp.lt.s32.totalorder %s1728_s25, %s1722_s13 }
 0x2bd   : > { %1056 = vst.msk [vmem:[%s547_s26] sm:$0xff] %vm553_vm1, %v1055_v6  ;;  %1296 = vst.msk [vmem:[%s547_s26 + $0x8] sm:$0xff] %vm553_vm1, %v1057_v7  ;;  %p1731_p12 = por %p1730_p6, %p1729_p3 }
 0x2be   : > { %1297 = vst.msk [vmem:[%s547_s26 + $0x10] sm:$0xff] %vm553_vm1, %v1060_v8 }
 0x2bf   : > { %p1732_p13 = pnand %p1731_p12, %p1725_p4 }
 0x2c1   : > { %1735 = shalt.err (!%p1732_p13)
}
 0x2c2   : > { %s1736_s2 = scalar_lea.hbm %s2254_s24, 384  ;;  %s1740_s16 = scalar_lea.hbm %s2359_s11, 768 }
 0x2c3   : > { %p1737_p0 = scmp.ne.s32.totalorder %s2254_s24, %s1736_s2  ;;  %p1741_p9 = scmp.lt.u32.totalorder %s2254_s24, %s2359_s11 }
 0x2c4   : > { %p1742_p1 = scmp.lt.u32.totalorder %s1740_s16, %s1736_s2  ;;  %p1744_p5 = scmp.lt.u32.totalorder %s1736_s2, %s2254_s24 }
 0x2c5   : > { %p1738_p7 = pnand %p1737_p0, %p2357_p10 }
 0x2c6   : > { %p1743_p2 = por %p1742_p1, %p1741_p9 }
 0x2c7   : > { %p1739_p8 = pneg %p1738_p7 }
 0x2c8   : > { %p1745_p11 = por %p1744_p5, %p1743_p2 }
 0x2ca   : > { %p1746_p4 = pnand %p1745_p11, %p1739_p8 }
 0x2cc   : > { %1749 = shalt.err (!%p1746_p4)
}
 0x2cd   : > { %s1819_s14 = smov 128   ;;  %s1820_s26 = smov 256  }
 0x2ce   : > { %s1821_s29 = smov 8  }
 0x2cf   : > { %1442 = dma.vmem_to_hbm [thread:$0]  (%p2357_p10), %s2247_s9, 384, %s2254_s24, %s1069_s12, %s1819_s14, %s1820_s26, %s1821_s29  }
 0x2d0 PF: > { %s2360_s15 = sld [smem:[#allocation23_spill]]  ;;  %s2361_s13 = sld [smem:[#allocation27_spill]] }
 0x2d1   : > { %p2363_p6 = scmp.ge.s32.totalorder %s1804_s20, 2 }
 0x2d6   : > { %s1109_s21 = sand.u32 1, %s2360_s15   ;;  %p2362_p3 = scmp.ne.s32.totalorder %s2361_s13, 0 }
 0x2d7   : > { %s1110_s22 = scalar_lea.sflag [#allocation4], %s1109_s21 }
 0x2d8   : > { %p1462_p12 = pnand %p2363_p6, %p2362_p3 }
 0x2da   : > { %1783 = dma.done.wait (!%p1462_p12), %s1110_s22, 128  }
 0x2db   : > { %1785 = vsyncadd (!%p1462_p12), %s1110_s22, 4294967168  ;;  %s1119_s25 = scalar_lea.sflag [#allocation16], %s1109_s21 }
 0x2dc   : > { %1787 = dma.done.wait (!%p1462_p12), %s1119_s25, 384  }
 0x2dd   : > { %1789 = vsyncadd (!%p1462_p12), %s1119_s25, 4294966912  ;;  %s2364_s20 = sld [smem:[#allocation24_spill]]  ;;  %s2365_s2 = sld [smem:[#allocation25_spill]] }
 0x2de   : > { %s2366_s17 = smov %s1796_s18  ;;  %s2367_s18 = smov %s1800_s19 }
 0x2e3   : > { %p31_p10 = scmp.ge.s32.totalorder %s2364_s20, 4   ;;  %s2368_s19 = smov %s2365_s2 }
 0x2e5   :  { %33 = sbr.rel (!%p31_p10) target bundleno = 16 (0x10), region = 190 }
 0x2ec   :  { %1124 = vsyncpa [#allocation3], 1 }
 0x2ed   :  { %1126 = vsyncpa [#allocation3 + $0x1], 1 }
 0x2ee   :  { %1127 = vsyncpa [#allocation7], 1 }
 0x2ef   :  { %1128 = vsyncpa [#allocation10], 1 }
 0x2f0   :  { %1129 = vsyncpa [#allocation13], 1 }
 0x2f1   :  { %1130 = vsyncpa [#allocation4], 1 }
 0x2f2   :  { %1132 = vsyncpa [#allocation4 + $0x1], 1 }
 0x2f3   :  { %1133 = vsyncpa [#allocation16], 1 }
 0x2f4   :  { %1135 = vsyncpa [#allocation16 + $0x1], 1 }

</bundles_post_ra>
